<compile_context>
chip_gen: v7x
topology: tpu7x:2x2x1
jax: 0.10.0
libtpu: 0.0.40
codegen_flags: <defaults>
</compile_context>

<pallas_src>
import jax
import jax.numpy as jnp
from jax.experimental import pallas as pl
from jax.experimental.pallas import tpu as pltpu

# Logical layer sizes from the PyTorch module.
LAYER_DIMS = [101, 202, 202, 150, 50, 1]


def _round_up(x: int, m: int) -> int:
    return ((x + m - 1) // m) * m


def _cdiv(a: int, b: int) -> int:
    return -(-a // b)


# Padded (TPU-aligned) feature sizes: [128, 256, 256, 256, 128, 128]
PAD_DIMS = [_round_up(d, 128) for d in LAYER_DIMS]
IN_DIM = LAYER_DIMS[0]          # 101
IN_PAD = PAD_DIMS[0]            # 128

# Batch tile cap (multiple of 256 = full MXU height on v6e/v7x, 2x128 on v5e).
MAX_BATCH_TILE = 1024


def mlp_kernel(x_ref,
               w1_ref, b1_ref,
               w2_ref, b2_ref,
               w3_ref, b3_ref,
               w4_ref, b4_ref,
               w5_ref, b5_ref,
               o_ref,
               xpad_ref):
    """Forward of the whole 5-layer MLP for one (TB, 101) batch tile."""
    cdt = w1_ref.dtype  # MXU compute dtype (bf16 default, f32 exact path)

    # Zero-fill the (TB, 128) VMEM pad tile, then drop the (TB, 101) input
    # into its first 101 lanes (masked store). Columns 101..127 stay zero,
    # matching zero-padded weight rows.
    xpad_ref[...] = jnp.zeros_like(xpad_ref)
    xpad_ref[:, :IN_DIM] = x_ref[...]

    h = jnp.dot(xpad_ref[...].astype(cdt), w1_ref[...],
                preferred_element_type=jnp.float32) + b1_ref[...]
    h = jnp.maximum(h, 0.0).astype(cdt)      # cast right after ReLU (feeds MXU)

    h = jnp.dot(h, w2_ref[...],
                preferred_element_type=jnp.float32) + b2_ref[...]
    h = jnp.maximum(h, 0.0).astype(cdt)

    h = jnp.dot(h, w3_ref[...],
                preferred_element_type=jnp.float32) + b3_ref[...]
    h = jnp.maximum(h, 0.0).astype(cdt)

    h = jnp.dot(h, w4_ref[...],
                preferred_element_type=jnp.float32) + b4_ref[...]
    h = jnp.maximum(h, 0.0)                  # stays f32: feeds VPU/XLU, no MXU

    # Final (50 -> 1) layer: VPU multiply + lane reduction (XLU), no MXU,
    # and only one f32 column written back instead of a padded 128-wide slab.
    b5 = b5_ref[0, 0]
    o_ref[...] = jnp.sum(h * w5_ref[...], axis=-1, keepdims=True) + b5


def prepare_params(params, weight_dtype=jnp.bfloat16):
    """Pad (W:(in,out), b:(out,)) params to TPU-aligned tiles. Call ONCE at init.

    Returns a flat tuple:
      (W1,b1, W2,b2, W3,b3, W4,b4, w5_row, b5_scalar)
    W1..W4 in `weight_dtype` (default bf16 = MXU-native); biases, w5_row and
    b5 stay float32 (f32 accumulate / bias / final reduce).
    """
    flat = []
    n_layers = len(LAYER_DIMS) - 1
    for li, (W, b) in enumerate(params):
        din, dout = LAYER_DIMS[li], LAYER_DIMS[li + 1]
        dip, dop = PAD_DIMS[li], PAD_DIMS[li + 1]
        if li < n_layers - 1:
            Wp = (jnp.zeros((dip, dop), weight_dtype)
                  .at[:din, :dout].set(jnp.asarray(W, weight_dtype)))
            bp = jnp.zeros((1, dop), jnp.float32).at[0, :dout].set(
                jnp.asarray(b, jnp.float32))
            flat += [Wp, bp]
        else:
            # Last layer (50 -> 1): keep its single output column as a lane
            # row (1, 128) for the in-kernel multiply+reduce; bias as (1,1).
            w_row = jnp.zeros((1, dip), jnp.float32).at[0, :din].set(
                jnp.asarray(W, jnp.float32)[:, 0])
            b_last = jnp.asarray(b, jnp.float32).reshape(1, 1)
            flat += [w_row, b_last]
    return tuple(flat)


def _choose_batch_tile(B: int) -> int:
    """Static batch-tile choice: big tiles to amortize per-step overhead,
    preferring an even grid-step count (v7x megacore), tiny batches get one tile."""
    if B <= 256:
        return _round_up(max(B, 1), 8)
    cands = list(range(256, MAX_BATCH_TILE + 1, 256))
    even = [t for t in cands if _cdiv(B, t) % 2 == 0]
    pool = even if even else cands
    # Minimize padded work (num_tiles * tile); tie-break toward fewer, larger tiles.
    return min(pool, key=lambda t: (_cdiv(B, t) * t, _cdiv(B, t)))


@jax.jit
def net_forward(x, padded_params):
    """x: (B, 101) float32; padded_params from prepare_params(). Returns (B,)."""
    B = x.shape[0]
    TB = _choose_batch_tile(B)
    num_tiles = pl.cdiv(B, TB)

    x = x.astype(jnp.float32)
    w1, b1, w2, b2, w3, b3, w4, b4, w5, b5 = padded_params

    def const_map(i):  # weights/biases: same block every grid step (VMEM-resident)
        return (0, 0)

    in_specs = [
        # Unpadded x tile: last block dim == full array dim (101) -> legal.
        pl.BlockSpec((TB, IN_DIM), lambda i: (i, 0)),
        pl.BlockSpec(w1.shape, const_map), pl.BlockSpec(b1.shape, const_map),
        pl.BlockSpec(w2.shape, const_map), pl.BlockSpec(b2.shape, const_map),
        pl.BlockSpec(w3.shape, const_map), pl.BlockSpec(b3.shape, const_map),
        pl.BlockSpec(w4.shape, const_map), pl.BlockSpec(b4.shape, const_map),
        pl.BlockSpec(w5.shape, const_map),                        # (1,128) row
        pl.BlockSpec(memory_space=pltpu.MemorySpace.SMEM),        # b5 scalar
    ]
    out_specs = pl.BlockSpec((TB, 1), lambda i: (i, 0))
    out_shape = jax.ShapeDtypeStruct((B, 1), jnp.float32)

    # Advisory cost estimate so XLA schedules around the call sensibly.
    rows = num_tiles * TB
    flops = 2 * rows * sum(PAD_DIMS[i] * PAD_DIMS[i + 1] for i in range(4))
    flops += 2 * rows * PAD_DIMS[4]  # final multiply+reduce
    bytes_accessed = (B * IN_DIM * 4
                      + sum(int(a.size) * a.dtype.itemsize for a in padded_params)
                      + B * 4)

    out_p = pl.pallas_call(
        mlp_kernel,
        out_shape=out_shape,
        grid=(num_tiles,),
        in_specs=in_specs,
        out_specs=out_specs,
        scratch_shapes=[pltpu.VMEM((TB, IN_PAD), jnp.float32)],  # 101->128 pad tile
        compiler_params=pltpu.CompilerParams(
            dimension_semantics=("parallel",)),
        cost_estimate=pl.CostEstimate(
            flops=int(flops), transcendentals=0,
            bytes_accessed=int(bytes_accessed)),
    )(x, w1, b1, w2, b2, w3, b3, w4, b4, w5, b5)

    # Matches PyTorch `self.layers(x).flatten()`.
    return out_p[:, 0]


def init_params(key):
    """Deterministic init mimicking nn.Linear default U(-k, k), k = 1/sqrt(fan_in)."""
    params = []
    for li in range(len(LAYER_DIMS) - 1):
        din, dout = LAYER_DIMS[li], LAYER_DIMS[li + 1]
        key, kw, kb = jax.random.split(key, 3)
        bound = 1.0 / jnp.sqrt(jnp.float32(din))
        W = jax.random.uniform(kw, (din, dout), jnp.float32, -bound, bound)
        b = jax.random.uniform(kb, (dout,), jnp.float32, -bound, bound)
        params.append((W, b))
    return params


def reference_forward(x, params):
    """Pure-JAX f32 reference matching the PyTorch module."""
    h = x.astype(jnp.float32)
    for i, (W, b) in enumerate(params):
        h = h @ W + b
        if i < len(params) - 1:
            h = jnp.maximum(h, 0.0)
    return h.reshape(-1)


if __name__ == "__main__":
    key = jax.random.PRNGKey(0)
    key, kx1, kx2 = jax.random.split(key, 3)
    params = init_params(key)

    # Pad once, outside the forward path. f32 = exact module semantics,
    # bf16 (default) = MXU-native fast path on all generations.
    params_f32 = prepare_params(params, weight_dtype=jnp.float32)
    params_bf16 = prepare_params(params)  # default bf16 weights

    # Small batch: single small tile.
    B1 = 16
    x1 = jax.random.normal(kx1, (B1, LAYER_DIMS[0]), jnp.float32)
    out1 = jax.block_until_ready(net_forward(x1, params_f32))
    ref1 = reference_forward(x1, params)
    assert out1.shape == (B1,), out1.shape
    assert jnp.allclose(out1, ref1, atol=1e-4, rtol=1e-4)

    # Ragged multi-tile batch: two 256-row tiles, last tile partial (no host pad).
    B2 = 260
    x2 = jax.random.normal(kx2, (B2, LAYER_DIMS[0]), jnp.float32)
    out2 = jax.block_until_ready(net_forward(x2, params_f32))
    ref2 = reference_forward(x2, params)
    assert out2.shape == (B2,), out2.shape
    assert jnp.allclose(out2, ref2, atol=1e-4, rtol=1e-4)

    # Larger ragged batch exercising the big-tile path (TB=768, 2 grid steps).
    B3 = 1030
    x3 = jax.random.normal(kx2, (B3, LAYER_DIMS[0]), jnp.float32)
    out3 = jax.block_until_ready(net_forward(x3, params_f32))
    ref3 = reference_forward(x3, params)
    assert out3.shape == (B3,), out3.shape
    assert jnp.allclose(out3, ref3, atol=1e-4, rtol=1e-4)

    # Default bf16-weight fast path (f32 accumulation); looser tolerance vs f32 ref.
    out2_bf16 = jax.block_until_ready(net_forward(x2, params_bf16))
    assert out2_bf16.shape == (B2,)
    assert jnp.allclose(out2_bf16, ref2, atol=5e-2, rtol=5e-2)

    print("KERNEL_OK")
</pallas_src>

<mosaic_0001>
module attributes {stable_mosaic.version = 11 : i64} {
  func.func @mlp_kernel(%arg0: i32, %arg1: memref<16x101xf32, #tpu.memory_space<vmem>>, %arg2: memref<128x256xf32, #tpu.memory_space<vmem>>, %arg3: memref<1x256xf32, #tpu.memory_space<vmem>>, %arg4: memref<256x256xf32, #tpu.memory_space<vmem>>, %arg5: memref<1x256xf32, #tpu.memory_space<vmem>>, %arg6: memref<256x256xf32, #tpu.memory_space<vmem>>, %arg7: memref<1x256xf32, #tpu.memory_space<vmem>>, %arg8: memref<256x128xf32, #tpu.memory_space<vmem>>, %arg9: memref<1x128xf32, #tpu.memory_space<vmem>>, %arg10: memref<1x128xf32, #tpu.memory_space<vmem>>, %arg11: memref<1x1xf32, #tpu.memory_space<smem>>, %arg12: memref<16x1xf32, #tpu.memory_space<vmem>>, %arg13: memref<16x128xf32, #tpu.memory_space<vmem>>) attributes {dimension_semantics = [#tpu.dimension_semantics<parallel>], iteration_bounds = array<i64: 1>, scalar_prefetch = 0 : i64, scratch_operands = 1 : i64, tpu.core_type = #tpu.core_type<tc>, window_params = [{transform_indices = @transform_0, window_bounds = array<i64: 16, 101>}, {pipeline_mode = #tpu.pipeline_mode<synchronous>, transform_indices = @transform_1, window_bounds = array<i64: 128, 256>}, {pipeline_mode = #tpu.pipeline_mode<synchronous>, transform_indices = @transform_2, window_bounds = array<i64: 1, 256>}, {pipeline_mode = #tpu.pipeline_mode<synchronous>, transform_indices = @transform_3, window_bounds = array<i64: 256, 256>}, {pipeline_mode = #tpu.pipeline_mode<synchronous>, transform_indices = @transform_4, window_bounds = array<i64: 1, 256>}, {pipeline_mode = #tpu.pipeline_mode<synchronous>, transform_indices = @transform_5, window_bounds = array<i64: 256, 256>}, {pipeline_mode = #tpu.pipeline_mode<synchronous>, transform_indices = @transform_6, window_bounds = array<i64: 1, 256>}, {pipeline_mode = #tpu.pipeline_mode<synchronous>, transform_indices = @transform_7, window_bounds = array<i64: 256, 128>}, {pipeline_mode = #tpu.pipeline_mode<synchronous>, transform_indices = @transform_8, window_bounds = array<i64: 1, 128>}, {pipeline_mode = #tpu.pipeline_mode<synchronous>, transform_indices = @transform_9, window_bounds = array<i64: 1, 128>}, {transform_indices = @transform_10, window_bounds = array<i64: 1, 1>}, {transform_indices = @transform_11, window_bounds = array<i64: 16, 1>}]} {
    %cst = arith.constant 0.000000e+00 : f32
    %0 = vector.broadcast %cst : f32 to vector<16x128xf32>
    %c0 = arith.constant 0 : index
    %c0_0 = arith.constant 0 : index
    %1 = vector.load %arg13[%c0, %c0_0] : memref<16x128xf32, #tpu.memory_space<vmem>>, vector<16x128xf32>
    tpu.vector_store %arg13[%c0, %c0_0], %0 {strides = array<i32>} : memref<16x128xf32, #tpu.memory_space<vmem>>, vector<16x128xf32>,
    %c0_1 = arith.constant 0 : index
    %c0_2 = arith.constant 0 : index
    %2 = vector.load %arg1[%c0_1, %c0_2] : memref<16x101xf32, #tpu.memory_space<vmem>>, vector<16x101xf32>
    %c0_3 = arith.constant 0 : index
    %c0_4 = arith.constant 0 : index
    %3 = vector.load %arg13[%c0_3, %c0_4] : memref<16x128xf32, #tpu.memory_space<vmem>>, vector<16x101xf32>
    tpu.vector_store %arg13[%c0_3, %c0_4], %2 {strides = array<i32>} : memref<16x128xf32, #tpu.memory_space<vmem>>, vector<16x101xf32>,
    %c0_5 = arith.constant 0 : index
    %c0_6 = arith.constant 0 : index
    %4 = vector.load %arg13[%c0_5, %c0_6] : memref<16x128xf32, #tpu.memory_space<vmem>>, vector<16x128xf32>
    %c0_7 = arith.constant 0 : index
    %c0_8 = arith.constant 0 : index
    %5 = vector.load %arg2[%c0_7, %c0_8] : memref<128x256xf32, #tpu.memory_space<vmem>>, vector<128x256xf32>
    %cst_9 = arith.constant dense<0.000000e+00> : vector<16x256xf32>
    %6 = tpu.matmul %4, %5, %cst_9 {dimension_numbers = #tpu.dot_dimension_numbers<[1], [0], [0], [1], [0, 0, 1, 1], [], []>} : vector<16x128xf32>, vector<128x256xf32>, vector<16x256xf32> -> vector<16x256xf32>
    %c0_10 = arith.constant 0 : index
    %c0_11 = arith.constant 0 : index
    %7 = vector.load %arg3[%c0_10, %c0_11] : memref<1x256xf32, #tpu.memory_space<vmem>>, vector<1x256xf32>
    %8 = vector.broadcast %7 : vector<1x256xf32> to vector<16x256xf32>
    %9 = arith.addf %6, %8 : vector<16x256xf32>
    %cst_12 = arith.constant 0.000000e+00 : f32
    %10 = vector.broadcast %cst_12 : f32 to vector<16x256xf32>
    %11 = arith.maximumf %9, %10 : vector<16x256xf32>
    %c0_13 = arith.constant 0 : index
    %c0_14 = arith.constant 0 : index
    %12 = vector.load %arg4[%c0_13, %c0_14] : memref<256x256xf32, #tpu.memory_space<vmem>>, vector<256x256xf32>
    %cst_15 = arith.constant dense<0.000000e+00> : vector<16x256xf32>
    %13 = tpu.matmul %11, %12, %cst_15 {dimension_numbers = #tpu.dot_dimension_numbers<[1], [0], [0], [1], [0, 0, 1, 1], [], []>} : vector<16x256xf32>, vector<256x256xf32>, vector<16x256xf32> -> vector<16x256xf32>
    %c0_16 = arith.constant 0 : index
    %c0_17 = arith.constant 0 : index
    %14 = vector.load %arg5[%c0_16, %c0_17] : memref<1x256xf32, #tpu.memory_space<vmem>>, vector<1x256xf32>
    %15 = vector.broadcast %14 : vector<1x256xf32> to vector<16x256xf32>
    %16 = arith.addf %13, %15 : vector<16x256xf32>
    %cst_18 = arith.constant 0.000000e+00 : f32
    %17 = vector.broadcast %cst_18 : f32 to vector<16x256xf32>
    %18 = arith.maximumf %16, %17 : vector<16x256xf32>
    %c0_19 = arith.constant 0 : index
    %c0_20 = arith.constant 0 : index
    %19 = vector.load %arg6[%c0_19, %c0_20] : memref<256x256xf32, #tpu.memory_space<vmem>>, vector<256x256xf32>
    %cst_21 = arith.constant dense<0.000000e+00> : vector<16x256xf32>
    %20 = tpu.matmul %18, %19, %cst_21 {dimension_numbers = #tpu.dot_dimension_numbers<[1], [0], [0], [1], [0, 0, 1, 1], [], []>} : vector<16x256xf32>, vector<256x256xf32>, vector<16x256xf32> -> vector<16x256xf32>
    %c0_22 = arith.constant 0 : index
    %c0_23 = arith.constant 0 : index
    %21 = vector.load %arg7[%c0_22, %c0_23] : memref<1x256xf32, #tpu.memory_space<vmem>>, vector<1x256xf32>
    %22 = vector.broadcast %21 : vector<1x256xf32> to vector<16x256xf32>
    %23 = arith.addf %20, %22 : vector<16x256xf32>
    %cst_24 = arith.constant 0.000000e+00 : f32
    %24 = vector.broadcast %cst_24 : f32 to vector<16x256xf32>
    %25 = arith.maximumf %23, %24 : vector<16x256xf32>
    %c0_25 = arith.constant 0 : index
    %c0_26 = arith.constant 0 : index
    %26 = vector.load %arg8[%c0_25, %c0_26] : memref<256x128xf32, #tpu.memory_space<vmem>>, vector<256x128xf32>
    %cst_27 = arith.constant dense<0.000000e+00> : vector<16x128xf32>
    %27 = tpu.matmul %25, %26, %cst_27 {dimension_numbers = #tpu.dot_dimension_numbers<[1], [0], [0], [1], [0, 0, 1, 1], [], []>} : vector<16x256xf32>, vector<256x128xf32>, vector<16x128xf32> -> vector<16x128xf32>
    %c0_28 = arith.constant 0 : index
    %c0_29 = arith.constant 0 : index
    %28 = vector.load %arg9[%c0_28, %c0_29] : memref<1x128xf32, #tpu.memory_space<vmem>>, vector<1x128xf32>
    %29 = vector.broadcast %28 : vector<1x128xf32> to vector<16x128xf32>
    %30 = arith.addf %27, %29 : vector<16x128xf32>
    %cst_30 = arith.constant 0.000000e+00 : f32
    %31 = vector.broadcast %cst_30 : f32 to vector<16x128xf32>
    %32 = arith.maximumf %30, %31 : vector<16x128xf32>
    %c0_31 = arith.constant 0 : index
    %c0_32 = arith.constant 0 : index
    %33 = memref.load %arg11[%c0_31, %c0_32] : memref<1x1xf32, #tpu.memory_space<smem>>
    %c0_33 = arith.constant 0 : index
    %c0_34 = arith.constant 0 : index
    %34 = vector.load %arg10[%c0_33, %c0_34] : memref<1x128xf32, #tpu.memory_space<vmem>>, vector<1x128xf32>
    %35 = vector.broadcast %34 : vector<1x128xf32> to vector<16x128xf32>
    %36 = arith.mulf %32, %35 : vector<16x128xf32>
    %cst_35 = arith.constant dense<0.000000e+00> : vector<16xf32>
    %37 = vector.multi_reduction <add>, %36, %cst_35 [1] : vector<16x128xf32> to vector<16xf32>
    %38 = vector.shape_cast %37 : vector<16xf32> to vector<16x1xf32>
    %39 = vector.broadcast %33 : f32 to vector<16x1xf32>
    %40 = arith.addf %38, %39 : vector<16x1xf32>
    %c0_36 = arith.constant 0 : index
    %c0_37 = arith.constant 0 : index
    %41 = vector.load %arg12[%c0_36, %c0_37] : memref<16x1xf32, #tpu.memory_space<vmem>>, vector<16x1xf32>
    tpu.vector_store %arg12[%c0_36, %c0_37], %40 {strides = array<i32>} : memref<16x1xf32, #tpu.memory_space<vmem>>, vector<16x1xf32>,
    return
  }
  func.func @transform_0(%arg0: i32) -> (i32, i32) {
    %c0_i32 = arith.constant 0 : i32
    %c0_i32_0 = arith.constant 0 : i32
    return %arg0, %c0_i32 : i32, i32
  }
  func.func @transform_1(%arg0: i32) -> (i32, i32) {
    %c0_i32 = arith.constant 0 : i32
    %c0_i32_0 = arith.constant 0 : i32
    %c0_i32_1 = arith.constant 0 : i32
    return %c0_i32, %c0_i32_0 : i32, i32
  }
  func.func @transform_2(%arg0: i32) -> (i32, i32) {
    %c0_i32 = arith.constant 0 : i32
    %c0_i32_0 = arith.constant 0 : i32
    %c0_i32_1 = arith.constant 0 : i32
    return %c0_i32, %c0_i32_0 : i32, i32
  }
  func.func @transform_3(%arg0: i32) -> (i32, i32) {
    %c0_i32 = arith.constant 0 : i32
    %c0_i32_0 = arith.constant 0 : i32
    %c0_i32_1 = arith.constant 0 : i32
    return %c0_i32, %c0_i32_0 : i32, i32
  }
  func.func @transform_4(%arg0: i32) -> (i32, i32) {
    %c0_i32 = arith.constant 0 : i32
    %c0_i32_0 = arith.constant 0 : i32
    %c0_i32_1 = arith.constant 0 : i32
    return %c0_i32, %c0_i32_0 : i32, i32
  }
  func.func @transform_5(%arg0: i32) -> (i32, i32) {
    %c0_i32 = arith.constant 0 : i32
    %c0_i32_0 = arith.constant 0 : i32
    %c0_i32_1 = arith.constant 0 : i32
    return %c0_i32, %c0_i32_0 : i32, i32
  }
  func.func @transform_6(%arg0: i32) -> (i32, i32) {
    %c0_i32 = arith.constant 0 : i32
    %c0_i32_0 = arith.constant 0 : i32
    %c0_i32_1 = arith.constant 0 : i32
    return %c0_i32, %c0_i32_0 : i32, i32
  }
  func.func @transform_7(%arg0: i32) -> (i32, i32) {
    %c0_i32 = arith.constant 0 : i32
    %c0_i32_0 = arith.constant 0 : i32
    %c0_i32_1 = arith.constant 0 : i32
    return %c0_i32, %c0_i32_0 : i32, i32
  }
  func.func @transform_8(%arg0: i32) -> (i32, i32) {
    %c0_i32 = arith.constant 0 : i32
    %c0_i32_0 = arith.constant 0 : i32
    %c0_i32_1 = arith.constant 0 : i32
    return %c0_i32, %c0_i32_0 : i32, i32
  }
  func.func @transform_9(%arg0: i32) -> (i32, i32) {
    %c0_i32 = arith.constant 0 : i32
    %c0_i32_0 = arith.constant 0 : i32
    %c0_i32_1 = arith.constant 0 : i32
    return %c0_i32, %c0_i32_0 : i32, i32
  }
  func.func @transform_10(%arg0: i32) -> (i32, i32) {
    %c0_i32 = arith.constant 0 : i32
    %c0_i32_0 = arith.constant 0 : i32
    %c0_i32_1 = arith.constant 0 : i32
    return %c0_i32, %c0_i32_0 : i32, i32
  }
  func.func @transform_11(%arg0: i32) -> (i32, i32) {
    %c0_i32 = arith.constant 0 : i32
    %c0_i32_0 = arith.constant 0 : i32
    return %arg0, %c0_i32 : i32, i32
  }
}

</mosaic_0001>

<bundles_post_ra>
// kernel: net_forward.1
= control target key start
LH: loop header
LB: loop body
LE: loop exit
PB: predicated region body
PF: predicated region fallthrough
CT: control target
= control target key end

     0   :  { %17 = vsyncpa [#allocation5], 0  ;;  %s1241_s0 = inlined_call_operand.hbm [shape: f32[16,101], index: 0, kind: input, shape index: {}]   ;;  %s1242_s1 = inlined_call_operand.hbm [shape: f32[128,256], index: 1, kind: input, shape index: {}]   ;;  %s1243_s2 = inlined_call_operand.vmem [shape: f32[1,256], index: 2, kind: input, shape index: {}]   ;;  %s1244_s3 = inlined_call_operand.hbm [shape: f32[256,256], index: 3, kind: input, shape index: {}]   ;;  %s1245_s4 = inlined_call_operand.vmem [shape: f32[1,256], index: 4, kind: input, shape index: {}]   ;;  %s1246_s5 = inlined_call_operand.hbm [shape: f32[256,256], index: 5, kind: input, shape index: {}]   ;;  %s1247_s6 = inlined_call_operand.vmem [shape: f32[1,256], index: 6, kind: input, shape index: {}]   ;;  %s1248_s7 = inlined_call_operand.hbm [shape: f32[256,128], index: 7, kind: input, shape index: {}]   ;;  %s1249_s8 = inlined_call_operand.vmem [shape: f32[1,128], index: 8, kind: input, shape index: {}]   ;;  %s1250_s9 = inlined_call_operand.vmem [shape: f32[1,128], index: 9, kind: input, shape index: {}]   ;;  %s1251_s10 = inlined_call_operand.<no memory space> [shape: f32[1,1], index: 10, kind: input, shape index: {}]   ;;  %s1252_s11 = inlined_call_operand.vmem [shape: f32[16,1], index: 11, kind: output, shape index: {}]  }
   0x1   :  { %18 = vsyncpa [#allocation7], 0 }
   0x2   :  { %19 = vsyncpa [#allocation10], 0  ;;  %s1056_s17 = smov [#allocation6]   ;;  %s940_s21 = scalar_lea.hbm %s1242_s1, 4096 }
   0x3   :  { %s37_s18 = sshll.u32 %s1056_s17, 4  ;;  %p941_p0 = scmp.ne.s32.totalorder %s1242_s1, %s940_s21  ;;  %s38_s18 = int_to_ptr.vmem [resolvable:$true] %s37_s18 }
   0x4   :  { %p944_p1 = scmp.lt.u32.totalorder %s940_s21, %s1242_s1 }
   0x6   :  { %p946_p2 = pnand %p944_p1, %p941_p0 }
   0x8   :  { %949 = shalt.err (!%p946_p2)
}
   0x9   :  { %s950_s26 = scalar_lea.vmem %s38_s18, 4096  ;;  %p955_p4 = scmp.lt.s32.totalorder %s38_s18, %s38_s18 }
   0xa   :  { %p951_p3 = scmp.ne.s32.totalorder %s38_s18, %s950_s26  ;;  %p956_p5 = scmp.lt.s32.totalorder %s950_s26, %s950_s26 }
   0xc   :  { %p957_p6 = por %p956_p5, %p955_p4 }
   0xe   :  { %p958_p7 = pnand %p957_p6, %p951_p3 }
  0x10   :  { %961 = shalt.err (!%p958_p7)
}
  0x11   :  { %s1057_s27 = smov 256   ;;  %s1058_s28 = smov 16  }
  0x12   :  { %43 = dma.hbm_to_vmem [thread:$0]  %s1242_s1, 4096, %s38_s18, [#allocation7], %s1057_s27, %s1057_s27, %s1058_s28  }
  0x13   :  { %s1059_s12 = smov [#allocation9]   ;;  %s1060_s14 = smov [#allocation4]  }
  0x14   :  { %s65_s13 = sshll.u32 %s1059_s12, 4  ;;  %s25_s15 = sshll.u32 %s1060_s14, 4  ;;  %s66_s13 = int_to_ptr.vmem [resolvable:$true] %s65_s13  ;;  %s26_s15 = int_to_ptr.vmem [resolvable:$true] %s25_s15 }
  0x15   :  { %s962_s19 = scalar_lea.hbm %s1246_s5, 8192 }
  0x16   :  { %p963_p8 = scmp.ne.s32.totalorder %s1246_s5, %s962_s19  ;;  %p966_p9 = scmp.lt.u32.totalorder %s962_s19, %s1246_s5 }
  0x18   :  { %p968_p10 = pnand %p966_p9, %p963_p8 }
  0x1a   :  { %971 = shalt.err (!%p968_p10)
}
  0x1b   :  { %s972_s1 = scalar_lea.vmem %s66_s13, 8192  ;;  %p977_p12 = scmp.lt.s32.totalorder %s66_s13, %s66_s13 }
  0x1c   :  { %p973_p11 = scmp.ne.s32.totalorder %s66_s13, %s972_s1  ;;  %p978_p13 = scmp.lt.s32.totalorder %s972_s1, %s972_s1 }
  0x1e   :  { %p979_p0 = por %p978_p13, %p977_p12 }
  0x20   :  { %p980_p1 = pnand %p979_p0, %p973_p11 }
  0x22   :  { %983 = shalt.err (!%p980_p1)
}
  0x23   :  { %71 = dma.hbm_to_vmem [thread:$0]  %s1246_s5, 8192, %s66_s13, [#allocation10], %s1057_s27, %s1057_s27, %s1058_s28  }
  0x24   :  { %s984_s29 = scalar_lea.hbm %s1241_s0, 256 }
  0x25   :  { %p985_p2 = scmp.ne.s32.totalorder %s1241_s0, %s984_s29  ;;  %p988_p3 = scmp.lt.u32.totalorder %s984_s29, %s1241_s0 }
  0x27   :  { %p990_p4 = pnand %p988_p3, %p985_p2 }
  0x29   :  { %993 = shalt.err (!%p990_p4)
}
  0x2a   :  { %s994_s17 = scalar_lea.vmem %s26_s15, 256  ;;  %p999_p6 = scmp.lt.s32.totalorder %s26_s15, %s26_s15 }
  0x2b   :  { %p995_p5 = scmp.ne.s32.totalorder %s26_s15, %s994_s17  ;;  %p1000_p7 = scmp.lt.s32.totalorder %s994_s17, %s994_s17 }
  0x2d   :  { %p1001_p8 = por %p1000_p7, %p999_p6 }
  0x2f   :  { %p1002_p9 = pnand %p1001_p8, %p995_p5 }
  0x31   :  { %1005 = shalt.err (!%p1002_p9)
}
  0x32   :  { %s1061_s5 = smov 128   ;;  %s1062_s13 = smov 8  }
  0x33   :  { %31 = dma.hbm_to_vmem [thread:$0]  %s1241_s0, 256, %s26_s15, [#allocation5], %s1061_s5, %s1061_s5, %s1062_s13  }
  0x34   :  { %s1063_s21 = smov [#allocation8]   ;;  %s1064_s23 = smov [#allocation11]  }
  0x35   :  { %s51_s22 = sshll.u32 %s1063_s21, 4  ;;  %s79_s1 = sshll.u32 %s1064_s23, 4  ;;  %s52_s22 = int_to_ptr.vmem [resolvable:$true] %s51_s22  ;;  %s80_s1 = int_to_ptr.vmem [resolvable:$true] %s79_s1 }
  0x36   :  { %s1006_s25 = scalar_lea.hbm %s1244_s3, 8192 }
  0x37   :  { %p1007_p10 = scmp.ne.s32.totalorder %s1244_s3, %s1006_s25  ;;  %p1010_p11 = scmp.lt.u32.totalorder %s1006_s25, %s1244_s3 }
  0x39   :  { %p1012_p12 = pnand %p1010_p11, %p1007_p10 }
  0x3b   :  { %1015 = shalt.err (!%p1012_p12)
}
  0x3c   :  { %s1016_s0 = scalar_lea.vmem %s52_s22, 8192  ;;  %p1021_p0 = scmp.lt.s32.totalorder %s52_s22, %s52_s22 }
  0x3d   :  { %p1017_p13 = scmp.ne.s32.totalorder %s52_s22, %s1016_s0  ;;  %p1022_p1 = scmp.lt.s32.totalorder %s1016_s0, %s1016_s0 }
  0x3f   :  { %p1023_p2 = por %p1022_p1, %p1021_p0 }
  0x41   :  { %p1024_p3 = pnand %p1023_p2, %p1017_p13 }
  0x43   :  { %1027 = shalt.err (!%p1024_p3)
}
  0x44   :  { %57 = dma.hbm_to_vmem [thread:$0]  %s1244_s3, 8192, %s52_s22, [#allocation7], %s1057_s27, %s1057_s27, %s1058_s28  }
  0x45   :  { %s1028_s19 = scalar_lea.hbm %s1248_s7, 4096 }
  0x46   :  { %p1029_p4 = scmp.ne.s32.totalorder %s1248_s7, %s1028_s19  ;;  %p1032_p5 = scmp.lt.u32.totalorder %s1028_s19, %s1248_s7 }
  0x48   :  { %p1034_p6 = pnand %p1032_p5, %p1029_p4 }
  0x4a   :  { %1037 = shalt.err (!%p1034_p6)
}
  0x4b   :  { %s1038_s24 = scalar_lea.vmem %s80_s1, 4096  ;;  %p1043_p8 = scmp.lt.s32.totalorder %s80_s1, %s80_s1 }
  0x4c   :  { %p1039_p7 = scmp.ne.s32.totalorder %s80_s1, %s1038_s24  ;;  %p1044_p9 = scmp.lt.s32.totalorder %s1038_s24, %s1038_s24 }
  0x4e   :  { %p1045_p10 = por %p1044_p9, %p1043_p8 }
  0x50   :  { %p1046_p11 = pnand %p1045_p10, %p1039_p7 }
  0x52   :  { %1049 = shalt.err (!%p1046_p11)
}
  0x53   :  { %85 = dma.hbm_to_vmem [thread:$0]  %s1248_s7, 4096, %s80_s1, [#allocation10], %s1061_s5, %s1061_s5, %s1062_s13  }
  0x54   :  { %1050 = dma.done.wait [#allocation5], 256  }
  0x55   :  { %1051 = vsyncadd [#allocation5], 4294967040 }
  0x56   :  { %1052 = dma.done.wait [#allocation7], 12288  }
  0x57   :  { %1053 = vsyncadd [#allocation7], 4294955008 }
  0x58   :  { %1054 = dma.done.wait [#allocation10], 12288  }
  0x59   :  { %1055 = vsyncadd [#allocation10], 4294955008  ;;  %v1065_v0 = vmov 0.0   ;;  %v117_v1 = vld [vmem:[#allocation6 + $0x8] sm:$0xff]  ;;  %v119_v2 = vld [vmem:[#allocation6 + $0x18] sm:$0xff]  ;;  %vm111_vm0 = vcmask 826368  }
  0x5a   :  { %107 = vst [vmem:[#allocation2] sm:$0xff] %v1065_v0  ;;  %108 = vst [vmem:[#allocation2 + $0x8] sm:$0xff] %v1065_v0  ;;  %224 = vmatprep.mubr.f32.mxu0 %v1065_v0  ;;  %v116_v3 = vld [vmem:[#allocation6] sm:$0xff]  ;;  %v738_v4 = vpack.c.bf16 %v119_v2, %v117_v1  ;;  %v118_v5 = vld [vmem:[#allocation6 + $0x10] sm:$0xff]  ;;  %vm688_vm1 = vcmask 7168  }
  0x5b   :  { %v121_v6 = vld [vmem:[#allocation6 + $0x28] sm:$0xff]  ;;  %v123_v7 = vld [vmem:[#allocation6 + $0x38] sm:$0xff]  ;;  %v740_v8 = vpack.c.bf16 %v118_v5, %v116_v3  ;;  %v120_v10 = vld [vmem:[#allocation6 + $0x20] sm:$0xff] }
  0x5c   :  { %v742_v9 = vpack.c.bf16 %v123_v7, %v121_v6  ;;  %v122_v11 = vld [vmem:[#allocation6 + $0x30] sm:$0xff]  ;;  %v125_v12 = vld [vmem:[#allocation6 + $0x48] sm:$0xff]  ;;  %739 = vmatprep.subr.bf16.mxu0 %v738_v4  ;;  %v127_v13 = vld [vmem:[#allocation6 + $0x58] sm:$0xff] }
  0x5d   :  { %741 = vmatpush1.bf16.msra.mxu0 %v740_v8  ;;  %v744_v14 = vpack.c.bf16 %v122_v11, %v120_v10  ;;  %v746_v15 = vpack.c.bf16 %v127_v13, %v125_v12  ;;  %v124_v16 = vld [vmem:[#allocation6 + $0x40] sm:$0xff]  ;;  %v126_v17 = vld [vmem:[#allocation6 + $0x50] sm:$0xff]  ;;  %v129_v18 = vld [vmem:[#allocation6 + $0x68] sm:$0xff] }
  0x5e   :  { %743 = vmatprep.subr.bf16.mxu0 %v742_v9  ;;  %v131_v19 = vld [vmem:[#allocation6 + $0x78] sm:$0xff]  ;;  %v748_v20 = vpack.c.bf16 %v126_v17, %v124_v16  ;;  %v128_v22 = vld [vmem:[#allocation6 + $0x60] sm:$0xff]  ;;  %v130_v23 = vld [vmem:[#allocation6 + $0x70] sm:$0xff] }
  0x5f   :  { %v750_v21 = vpack.c.bf16 %v131_v19, %v129_v18  ;;  %v133_v24 = vld [vmem:[#allocation6 + $0x88] sm:$0xff]  ;;  %v135_v25 = vld [vmem:[#allocation6 + $0x98] sm:$0xff]  ;;  %v109_v26 = vld [vmem:[#allocation4] sm:$0xff]  ;;  %v752_v32 = vpack.c.bf16 %v130_v23, %v128_v22 }
  0x60   :  { %v132_v27 = vld [vmem:[#allocation6 + $0x80] sm:$0xff]  ;;  %v134_v28 = vld [vmem:[#allocation6 + $0x90] sm:$0xff]  ;;  %v110_v29 = vld [vmem:[#allocation4 + $0x8] sm:$0xff]  ;;  %112 = vst.msk [vmem:[#allocation2] sm:$0xff] %vm111_vm0, %v109_v26  ;;  %v754_v38 = vpack.c.bf16 %v135_v25, %v133_v24 }
  0x61   :  { %745 = vmatpush1.bf16.msra.mxu0 %v744_v14  ;;  %v242_v30 = vld [vmem:[#allocation8 + $0x8] sm:$0xff]  ;;  %v244_v31 = vld [vmem:[#allocation8 + $0x18] sm:$0xff]  ;;  %113 = vst.msk [vmem:[#allocation2 + $0x8] sm:$0xff] %vm111_vm0, %v110_v29  ;;  %v241_v35 = vld [vmem:[#allocation8] sm:$0xff]  ;;  %v756_v48 = vpack.c.bf16 %v134_v28, %v132_v27 }
  0x62   :  { %747 = vmatprep.subr.bf16.mxu0 %v746_v15  ;;  %v137_v33 = vld [vmem:[#allocation6 + $0xa8] sm:$0xff]  ;;  %v770_v34 = vpack.c.bf16 %v244_v31, %v242_v30  ;;  %v243_v36 = vld [vmem:[#allocation8 + $0x10] sm:$0xff]  ;;  %v248_v40 = vld [vmem:[#allocation8 + $0x38] sm:$0xff] }
  0x63   :  { %v246_v37 = vld [vmem:[#allocation8 + $0x28] sm:$0xff]  ;;  %v772_v39 = vpack.c.bf16 %v243_v36, %v241_v35  ;;  %v245_v41 = vld [vmem:[#allocation8 + $0x20] sm:$0xff]  ;;  %v247_v42 = vld [vmem:[#allocation8 + $0x30] sm:$0xff] }
  0x64   :  { %v139_v43 = vld [vmem:[#allocation6 + $0xb8] sm:$0xff]  ;;  %771 = vmatprep.subr.bf16.mxu1 %v770_v34  ;;  %v774_v44 = vpack.c.bf16 %v248_v40, %v246_v37  ;;  %v250_v45 = vld [vmem:[#allocation8 + $0x48] sm:$0xff]  ;;  %v776_v47 = vpack.c.bf16 %v247_v42, %v245_v41  ;;  %v136_v49 = vld [vmem:[#allocation6 + $0xa0] sm:$0xff] }
  0x65   :  { %749 = vmatpush1.bf16.msra.mxu0 %v748_v20  ;;  %v252_v46 = vld [vmem:[#allocation8 + $0x58] sm:$0xff]  ;;  %773 = vmatpush1.bf16.msra.mxu1 %v772_v39  ;;  %v249_v51 = vld [vmem:[#allocation8 + $0x40] sm:$0xff]  ;;  %v251_v52 = vld [vmem:[#allocation8 + $0x50] sm:$0xff]  ;;  %v758_v53 = vpack.c.bf16 %v139_v43, %v137_v33 }
  0x66   :  { %751 = vmatprep.subr.bf16.mxu0 %v750_v21  ;;  %775 = vmatprep.subr.bf16.mxu1 %v774_v44  ;;  %v778_v50 = vpack.c.bf16 %v252_v46, %v250_v45  ;;  %v138_v54 = vld [vmem:[#allocation6 + $0xb0] sm:$0xff]  ;;  %v254_v55 = vld [vmem:[#allocation8 + $0x68] sm:$0xff]  ;;  %v256_v56 = vld [vmem:[#allocation8 + $0x78] sm:$0xff]  ;;  %v780_v59 = vpack.c.bf16 %v251_v52, %v249_v51 }
  0x67   :  { %v141_v57 = vld [vmem:[#allocation6 + $0xc8] sm:$0xff]  ;;  %v143_v58 = vld [vmem:[#allocation6 + $0xd8] sm:$0xff]  ;;  %v760_v60 = vpack.c.bf16 %v138_v54, %v136_v49  ;;  %v140_v61 = vld [vmem:[#allocation6 + $0xc0] sm:$0xff]  ;;  %v782_v62 = vpack.c.bf16 %v256_v56, %v254_v55 }
  0x68   :  { %v253_v63 = vld [vmem:[#allocation8 + $0x60] sm:$0xff]  ;;  %v255_v1 = vld [vmem:[#allocation8 + $0x70] sm:$0xff]  ;;  %v762_v2 = vpack.c.bf16 %v143_v58, %v141_v57  ;;  %v258_v4 = vld [vmem:[#allocation8 + $0x88] sm:$0xff] }
  0x69   :  { %753 = vmatpush1.bf16.msra.mxu0 %v752_v32  ;;  %777 = vmatpush1.bf16.msra.mxu1 %v776_v47  ;;  %v142_v3 = vld [vmem:[#allocation6 + $0xd0] sm:$0xff]  ;;  %v260_v5 = vld [vmem:[#allocation8 + $0x98] sm:$0xff]  ;;  %v145_v6 = vld [vmem:[#allocation6 + $0xe8] sm:$0xff]  ;;  %v784_v8 = vpack.c.bf16 %v255_v1, %v253_v63 }
  0x6a   :  { %755 = vmatprep.subr.bf16.mxu0 %v754_v38  ;;  %779 = vmatprep.subr.bf16.mxu1 %v778_v50  ;;  %v147_v7 = vld [vmem:[#allocation6 + $0xf8] sm:$0xff]  ;;  %v764_v9 = vpack.c.bf16 %v142_v3, %v140_v61  ;;  %v144_v10 = vld [vmem:[#allocation6 + $0xe0] sm:$0xff]  ;;  %v786_v11 = vpack.c.bf16 %v260_v5, %v258_v4  ;;  %v259_v13 = vld [vmem:[#allocation8 + $0x90] sm:$0xff] }
  0x6b   :  { %v257_v12 = vld [vmem:[#allocation8 + $0x80] sm:$0xff]  ;;  %v766_v14 = vpack.c.bf16 %v147_v7, %v145_v6  ;;  %v146_v15 = vld [vmem:[#allocation6 + $0xf0] sm:$0xff]  ;;  %v262_v16 = vld [vmem:[#allocation8 + $0xa8] sm:$0xff] }
  0x6c   :  { %v264_v17 = vld [vmem:[#allocation8 + $0xb8] sm:$0xff]  ;;  %v788_v18 = vpack.c.bf16 %v259_v13, %v257_v12  ;;  %v768_v19 = vpack.c.bf16 %v146_v15, %v144_v10  ;;  %v261_v21 = vld [vmem:[#allocation8 + $0xa0] sm:$0xff]  ;;  %v263_v22 = vld [vmem:[#allocation8 + $0xb0] sm:$0xff] }
  0x6d   :  { %757 = vmatpush1.bf16.msra.mxu0 %v756_v48  ;;  %781 = vmatpush1.bf16.msra.mxu1 %v780_v59  ;;  %v790_v20 = vpack.c.bf16 %v264_v17, %v262_v16  ;;  %v266_v23 = vld [vmem:[#allocation8 + $0xc8] sm:$0xff]  ;;  %v268_v24 = vld [vmem:[#allocation8 + $0xd8] sm:$0xff]  ;;  %v792_v25 = vpack.c.bf16 %v263_v22, %v261_v21  ;;  %v114_v26 = vld [vmem:[#allocation2] sm:$0xff] }
  0x6e   :  { %759 = vmatprep.subr.bf16.mxu0 %v758_v53  ;;  %783 = vmatprep.subr.bf16.mxu1 %v782_v62  ;;  %v794_v27 = vpack.c.bf16 %v268_v24, %v266_v23  ;;  %v265_v28 = vld [vmem:[#allocation8 + $0xc0] sm:$0xff]  ;;  %v267_v29 = vld [vmem:[#allocation8 + $0xd0] sm:$0xff]  ;;  %v270_v30 = vld [vmem:[#allocation8 + $0xe8] sm:$0xff] }
  0x6f   :  { %v272_v31 = vld [vmem:[#allocation8 + $0xf8] sm:$0xff]  ;;  %v796_v32 = vpack.c.bf16 %v267_v29, %v265_v28  ;;  %v115_v33 = vld [vmem:[#allocation2 + $0x8] sm:$0xff]  ;;  %v269_v35 = vld [vmem:[#allocation8 + $0xe0] sm:$0xff] }
  0x70   :  { %v798_v34 = vpack.c.bf16 %v272_v31, %v270_v30  ;;  %v271_v36 = vld [vmem:[#allocation8 + $0xf0] sm:$0xff]  ;;  %v274_v37 = vld [vmem:[#allocation8 + $0x108] sm:$0xff]  ;;  %v276_v38 = vld [vmem:[#allocation8 + $0x118] sm:$0xff] }
  0x71   :  { %761 = vmatpush1.bf16.msra.mxu0 %v760_v60  ;;  %785 = vmatpush1.bf16.msra.mxu1 %v784_v8  ;;  %v800_v39 = vpack.c.bf16 %v271_v36, %v269_v35  ;;  %v802_v40 = vpack.c.bf16 %v276_v38, %v274_v37  ;;  %v273_v41 = vld [vmem:[#allocation8 + $0x100] sm:$0xff]  ;;  %v275_v42 = vld [vmem:[#allocation8 + $0x110] sm:$0xff]  ;;  %v278_v43 = vld [vmem:[#allocation8 + $0x128] sm:$0xff] }
  0x72   :  { %763 = vmatprep.subr.bf16.mxu0 %v762_v2  ;;  %787 = vmatprep.subr.bf16.mxu1 %v786_v11  ;;  %v280_v44 = vld [vmem:[#allocation8 + $0x138] sm:$0xff]  ;;  %v804_v45 = vpack.c.bf16 %v275_v42, %v273_v41  ;;  %v277_v46 = vld [vmem:[#allocation8 + $0x120] sm:$0xff]  ;;  %v279_v47 = vld [vmem:[#allocation8 + $0x130] sm:$0xff] }
  0x73   :  { %v282_v48 = vld [vmem:[#allocation8 + $0x148] sm:$0xff]  ;;  %v284_v49 = vld [vmem:[#allocation8 + $0x158] sm:$0xff]  ;;  %v808_v50 = vpack.c.bf16 %v279_v47, %v277_v46  ;;  %v281_v52 = vld [vmem:[#allocation8 + $0x140] sm:$0xff] }
  0x74   :  { %v810_v51 = vpack.c.bf16 %v284_v49, %v282_v48  ;;  %v283_v53 = vld [vmem:[#allocation8 + $0x150] sm:$0xff]  ;;  %v286_v54 = vld [vmem:[#allocation8 + $0x168] sm:$0xff]  ;;  %v288_v55 = vld [vmem:[#allocation8 + $0x178] sm:$0xff] }
  0x75   :  { %765 = vmatpush1.bf16.msra.mxu0 %v764_v9  ;;  %789 = vmatpush1.bf16.msra.mxu1 %v788_v18  ;;  %v812_v56 = vpack.c.bf16 %v283_v53, %v281_v52  ;;  %v814_v57 = vpack.c.bf16 %v288_v55, %v286_v54  ;;  %v285_v58 = vld [vmem:[#allocation8 + $0x160] sm:$0xff]  ;;  %v287_v59 = vld [vmem:[#allocation8 + $0x170] sm:$0xff]  ;;  %v290_v60 = vld [vmem:[#allocation8 + $0x188] sm:$0xff] }
  0x76   :  { %767 = vmatprep.subr.bf16.mxu0 %v766_v14  ;;  %791 = vmatprep.subr.bf16.mxu1 %v790_v20  ;;  %v292_v61 = vld [vmem:[#allocation8 + $0x198] sm:$0xff]  ;;  %v816_v62 = vpack.c.bf16 %v287_v59, %v285_v58  ;;  %v289_v1 = vld [vmem:[#allocation8 + $0x180] sm:$0xff]  ;;  %v291_v2 = vld [vmem:[#allocation8 + $0x190] sm:$0xff] }
  0x77   :  { %v818_v63 = vpack.c.bf16 %v292_v61, %v290_v60  ;;  %v294_v3 = vld [vmem:[#allocation8 + $0x1a8] sm:$0xff]  ;;  %v296_v4 = vld [vmem:[#allocation8 + $0x1b8] sm:$0xff]  ;;  %v820_v5 = vpack.c.bf16 %v291_v2, %v289_v1  ;;  %v293_v7 = vld [vmem:[#allocation8 + $0x1a0] sm:$0xff] }
  0x78   :  { %v822_v6 = vpack.c.bf16 %v296_v4, %v294_v3  ;;  %v295_v8 = vld [vmem:[#allocation8 + $0x1b0] sm:$0xff]  ;;  %v298_v9 = vld [vmem:[#allocation8 + $0x1c8] sm:$0xff]  ;;  %v300_v10 = vld [vmem:[#allocation8 + $0x1d8] sm:$0xff] }
  0x79   :  { %769 = vmatpush1.bf16.msra.mxu0 %v768_v19  ;;  %793 = vmatpush1.bf16.msra.mxu1 %v792_v25  ;;  %v824_v11 = vpack.c.bf16 %v295_v8, %v293_v7  ;;  %v826_v12 = vpack.c.bf16 %v300_v10, %v298_v9  ;;  %v297_v13 = vld [vmem:[#allocation8 + $0x1c0] sm:$0xff]  ;;  %v299_v14 = vld [vmem:[#allocation8 + $0x1d0] sm:$0xff]  ;;  %v302_v16 = vld [vmem:[#allocation8 + $0x1e8] sm:$0xff] }
  0x7a   :  { %795 = vmatprep.subr.bf16.mxu1 %v794_v27  ;;  %v828_v15 = vpack.c.bf16 %v299_v14, %v297_v13  ;;  %v304_v17 = vld [vmem:[#allocation8 + $0x1f8] sm:$0xff]  ;;  %v301_v19 = vld [vmem:[#allocation8 + $0x1e0] sm:$0xff]  ;;  %v303_v20 = vld [vmem:[#allocation8 + $0x1f0] sm:$0xff] }
  0x7b   :  { %v830_v18 = vpack.c.bf16 %v304_v17, %v302_v16  ;;  %v832_v21 = vpack.c.bf16 %v303_v20, %v301_v19  ;;  %v399_v22 = vld [vmem:[#allocation9 + $0x8] sm:$0xff]  ;;  %v401_v23 = vld [vmem:[#allocation9 + $0x18] sm:$0xff]  ;;  %v398_v24 = vld [vmem:[#allocation9] sm:$0xff] }
  0x7c   :  { %225 = vmatmul.mubr.f32.vlgmr.msra.gmra.mrb[0].mxu0 %v114_v26  ;;  %v834_v25 = vpack.c.bf16 %v401_v23, %v399_v22  ;;  %v400_v26 = vld [vmem:[#allocation9 + $0x10] sm:$0xff]  ;;  %v403_v27 = vld [vmem:[#allocation9 + $0x28] sm:$0xff]  ;;  %v405_v28 = vld [vmem:[#allocation9 + $0x38] sm:$0xff] }
  0x7d   :  { %230 = vmatprep.mubr.f32.mxu0 %v1065_v0  ;;  %797 = vmatpush1.bf16.msra.mxu1 %v796_v32  ;;  %v806_v0 = vpack.c.bf16 %v280_v44, %v278_v43  ;;  %v836_v29 = vpack.c.bf16 %v400_v26, %v398_v24  ;;  %v838_v30 = vpack.c.bf16 %v405_v28, %v403_v27  ;;  %v402_v31 = vld [vmem:[#allocation9 + $0x20] sm:$0xff]  ;;  %v404_v32 = vld [vmem:[#allocation9 + $0x30] sm:$0xff]  ;;  %v439_v17 = vld [vmem:[#allocation9 + $0x148] sm:$0xff] }
  0x7e   :  { %799 = vmatprep.subr.bf16.mxu1 %v798_v34  ;;  %835 = vmatprep.subr.bf16.mxu0 %v834_v25  ;;  %v409_v34 = vld [vmem:[#allocation9 + $0x58] sm:$0xff]  ;;  %v840_v35 = vpack.c.bf16 %v404_v32, %v402_v31  ;;  %v406_v37 = vld [vmem:[#allocation9 + $0x40] sm:$0xff]  ;;  %v408_v38 = vld [vmem:[#allocation9 + $0x50] sm:$0xff] }
  0x7f   :  { %837 = vmatpush1.bf16.msra.mxu0 %v836_v29  ;;  %v844_v41 = vpack.c.bf16 %v408_v38, %v406_v37  ;;  %v410_v43 = vld [vmem:[#allocation9 + $0x60] sm:$0xff]  ;;  %v412_v44 = vld [vmem:[#allocation9 + $0x70] sm:$0xff]  ;;  %v443_v23 = vld [vmem:[#allocation9 + $0x168] sm:$0xff] }
  0x80   :  { %231 = vmatmul.mubr.f32.gmra.mrb[2].mxu0 %v115_v33  ;;  %v407_v33 = vld [vmem:[#allocation9 + $0x48] sm:$0xff]  ;;  %839 = vmatprep.subr.bf16.mxu0 %v838_v30  ;;  %v848_v46 = vpack.c.bf16 %v412_v44, %v410_v43  ;;  %v414_v48 = vld [vmem:[#allocation9 + $0x80] sm:$0xff]  ;;  %v416_v49 = vld [vmem:[#allocation9 + $0x90] sm:$0xff] }
  0x81   :  { %801 = vmatpush1.bf16.msra.mxu1 %v800_v39  ;;  %v842_v36 = vpack.c.bf16 %v409_v34, %v407_v33  ;;  %v411_v39 = vld [vmem:[#allocation9 + $0x68] sm:$0xff]  ;;  %v852_v52 = vpack.c.bf16 %v416_v49, %v414_v48  ;;  %v418_v54 = vld [vmem:[#allocation9 + $0xa0] sm:$0xff]  ;;  %v420_v55 = vld [vmem:[#allocation9 + $0xb0] sm:$0xff] }
  0x82   :  { %803 = vmatprep.subr.bf16.mxu1 %v802_v40  ;;  %v413_v40 = vld [vmem:[#allocation9 + $0x78] sm:$0xff]  ;;  %v856_v58 = vpack.c.bf16 %v420_v55, %v418_v54  ;;  %v422_v60 = vld [vmem:[#allocation9 + $0xc0] sm:$0xff]  ;;  %v424_v61 = vld [vmem:[#allocation9 + $0xd0] sm:$0xff] }
  0x83   :  { %841 = vmatpush1.bf16.msra.mxu0 %v840_v35  ;;  %v846_v42 = vpack.c.bf16 %v413_v40, %v411_v39  ;;  %v860_v1 = vpack.c.bf16 %v424_v61, %v422_v60  ;;  %v426_v3 = vld [vmem:[#allocation9 + $0xe0] sm:$0xff]  ;;  %v428_v4 = vld [vmem:[#allocation9 + $0xf0] sm:$0xff]  ;;  %v445_v24 = vld [vmem:[#allocation9 + $0x178] sm:$0xff] }
  0x84   :  { %843 = vmatprep.subr.bf16.mxu0 %v842_v36  ;;  %v864_v7 = vpack.c.bf16 %v428_v4, %v426_v3  ;;  %v430_v9 = vld [vmem:[#allocation9 + $0x100] sm:$0xff]  ;;  %v432_v10 = vld [vmem:[#allocation9 + $0x110] sm:$0xff]  ;;  %v878_v26 = vpack.c.bf16 %v445_v24, %v443_v23  ;;  %v447_v29 = vld [vmem:[#allocation9 + $0x188] sm:$0xff] }
  0x85   :  { %805 = vmatpush1.bf16.msra.mxu1 %v804_v45  ;;  %v415_v45 = vld [vmem:[#allocation9 + $0x88] sm:$0xff]  ;;  %v868_v13 = vpack.c.bf16 %v432_v10, %v430_v9  ;;  %v436_v16 = vld [vmem:[#allocation9 + $0x130] sm:$0xff]  ;;  %v442_v27 = vld [vmem:[#allocation9 + $0x160] sm:$0xff] }
  0x86   :  { %807 = vmatprep.subr.bf16.mxu1 %v806_v0  ;;  %v417_v0 = vld [vmem:[#allocation9 + $0x98] sm:$0xff]  ;;  %v440_v22 = vld [vmem:[#allocation9 + $0x150] sm:$0xff]  ;;  %v446_v33 = vld [vmem:[#allocation9 + $0x180] sm:$0xff] }
  0x87   :  { %845 = vmatpush1.bf16.msra.mxu0 %v844_v41  ;;  %v850_v47 = vpack.c.bf16 %v417_v0, %v415_v45  ;;  %v444_v28 = vld [vmem:[#allocation9 + $0x170] sm:$0xff]  ;;  %v449_v30 = vld [vmem:[#allocation9 + $0x198] sm:$0xff]  ;;  %v451_v35 = vld [vmem:[#allocation9 + $0x1a8] sm:$0xff]  ;;  %v150_v45 = vlaneseq }
  0x88   :  { %847 = vmatprep.subr.bf16.mxu0 %v846_v42  ;;  %v880_v31 = vpack.c.bf16 %v444_v28, %v442_v27  ;;  %v882_v32 = vpack.c.bf16 %v449_v30, %v447_v29  ;;  %v448_v34 = vld [vmem:[#allocation9 + $0x190] sm:$0xff]  ;;  %v453_v36 = vld [vmem:[#allocation9 + $0x1b8] sm:$0xff]  ;;  %v450_v39 = vld [vmem:[#allocation9 + $0x1a0] sm:$0xff] }
  0x89   :  { %809 = vmatpush1.bf16.msra.mxu1 %v808_v50  ;;  %v419_v50 = vld [vmem:[#allocation9 + $0xa8] sm:$0xff]  ;;  %v884_v37 = vpack.c.bf16 %v448_v34, %v446_v33  ;;  %v886_v38 = vpack.c.bf16 %v453_v36, %v451_v35  ;;  %v452_v40 = vld [vmem:[#allocation9 + $0x1b0] sm:$0xff]  ;;  %v457_v42 = vld [vmem:[#allocation9 + $0x1d8] sm:$0xff]  ;;  %v151_v0 = vshrl.u32 %v150_v45, 7 }
  0x8a   :  { %811 = vmatprep.subr.bf16.mxu1 %v810_v51  ;;  %v421_v51 = vld [vmem:[#allocation9 + $0xb8] sm:$0xff]  ;;  %v455_v41 = vld [vmem:[#allocation9 + $0x1c8] sm:$0xff]  ;;  %v888_v43 = vpack.c.bf16 %v452_v40, %v450_v39  ;;  %v571_v9 = vld [vmem:[#allocation11 + $0x80] sm:$0xff] }
  0x8b   :  { %849 = vmatpush1.bf16.msra.mxu0 %v848_v46  ;;  %v854_v53 = vpack.c.bf16 %v421_v51, %v419_v50  ;;  %v890_v44 = vpack.c.bf16 %v457_v42, %v455_v41  ;;  %v1207_v46 = vsub.s32 0, %v151_v0  ;;  %v1212_v48 = vsub.s32 1, %v151_v0  ;;  %v459_v3 = vld [vmem:[#allocation9 + $0x1e8] sm:$0xff]  ;;  %v461_v4 = vld [vmem:[#allocation9 + $0x1f8] sm:$0xff]  ;;  %v559_v24 = vld [vmem:[#allocation11 + $0x20] sm:$0xff] }
  0x8c   :  { %851 = vmatprep.subr.bf16.mxu0 %v850_v47  ;;  %v148_v47 = vld [vmem:[%s1243_s2] sm:$0x3]  ;;  %v572_v10 = vld [vmem:[#allocation11 + $0x88] sm:$0xff]  ;;  %v578_v27 = vld [vmem:[#allocation11 + $0xb8] sm:$0xff] }
  0x8d   :  { %813 = vmatpush1.bf16.msra.mxu1 %v812_v56  ;;  %v423_v56 = vld [vmem:[#allocation9 + $0xc8] sm:$0xff]  ;;  %v153_v49 = vrot.slane %v148_v47, %v1207_v46  ;;  %v157_v50 = vrot.slane %v148_v47, %v1212_v48  ;;  %v561_v30 = vld [vmem:[#allocation11 + $0x30] sm:$0xff]  ;;  %v563_v36 = vld [vmem:[#allocation11 + $0x40] sm:$0xff] }
  0x8e   :  { %815 = vmatprep.subr.bf16.mxu1 %v814_v57  ;;  %v425_v57 = vld [vmem:[#allocation9 + $0xd8] sm:$0xff]  ;;  %v580_v33 = vld [vmem:[#allocation11 + $0xc8] sm:$0xff]  ;;  %v565_v42 = vld [vmem:[#allocation11 + $0x50] sm:$0xff] }
  0x8f   :  { %853 = vmatpush1.bf16.msra.mxu0 %v852_v52  ;;  %v858_v59 = vpack.c.bf16 %v425_v57, %v423_v56  ;;  %v582_v39 = vld [vmem:[#allocation11 + $0xd8] sm:$0xff]  ;;  %v584_v45 = vld [vmem:[#allocation11 + $0xe8] sm:$0xff] }
  0x90   :  { %855 = vmatprep.subr.bf16.mxu0 %v854_v53 }
  0x91   :  { %817 = vmatpush1.bf16.msra.mxu1 %v816_v62  ;;  %v427_v62 = vld [vmem:[#allocation9 + $0xe8] sm:$0xff] }
  0x92   :  { %819 = vmatprep.subr.bf16.mxu1 %v818_v63  ;;  %v429_v63 = vld [vmem:[#allocation9 + $0xf8] sm:$0xff] }
  0x93   :  { %857 = vmatpush1.bf16.msra.mxu0 %v856_v58  ;;  %v862_v2 = vpack.c.bf16 %v429_v63, %v427_v62  ;;  %v454_v63 = vld [vmem:[#allocation9 + $0x1c0] sm:$0xff] }
  0x94   :  { %859 = vmatprep.subr.bf16.mxu0 %v858_v59 }
  0x95   :  { %821 = vmatpush1.bf16.msra.mxu1 %v820_v5  ;;  %v431_v5 = vld [vmem:[#allocation9 + $0x108] sm:$0xff] }
  0x96   :  { %823 = vmatprep.subr.bf16.mxu1 %v822_v6  ;;  %v433_v6 = vld [vmem:[#allocation9 + $0x118] sm:$0xff] }
  0x97   :  { %861 = vmatpush1.bf16.msra.mxu0 %v860_v1  ;;  %v866_v8 = vpack.c.bf16 %v433_v6, %v431_v5  ;;  %v456_v1 = vld [vmem:[#allocation9 + $0x1d0] sm:$0xff]  ;;  %v894_v5 = vpack.c.bf16 %v461_v4, %v459_v3  ;;  %v458_v6 = vld [vmem:[#allocation9 + $0x1e0] sm:$0xff] }
  0x98   :  { %863 = vmatprep.subr.bf16.mxu0 %v862_v2  ;;  %v892_v2 = vpack.c.bf16 %v456_v1, %v454_v63  ;;  %v567_v1 = vld [vmem:[#allocation11 + $0x60] sm:$0xff]  ;;  %v585_v4 = vld [vmem:[#allocation11 + $0xf0] sm:$0xff] }
  0x99   :  { %825 = vmatpush1.bf16.msra.mxu1 %v824_v11  ;;  %v435_v11 = vld [vmem:[#allocation9 + $0x128] sm:$0xff] }
  0x9a   :  { %827 = vmatprep.subr.bf16.mxu1 %v826_v12  ;;  %v437_v12 = vld [vmem:[#allocation9 + $0x138] sm:$0xff] }
  0x9b   :  { %865 = vmatpush1.bf16.msra.mxu0 %v864_v7  ;;  %v870_v14 = vpack.c.bf16 %v437_v12, %v435_v11  ;;  %v460_v7 = vld [vmem:[#allocation9 + $0x1f0] sm:$0xff]  ;;  %v555_v11 = vld [vmem:[#allocation11] sm:$0xff]  ;;  %v898_v12 = vpack.c.bf16 %v572_v10, %v571_v9 }
  0x9c   :  { %867 = vmatprep.subr.bf16.mxu0 %v866_v8  ;;  %v896_v8 = vpack.c.bf16 %v460_v7, %v458_v6  ;;  %v569_v7 = vld [vmem:[#allocation11 + $0x70] sm:$0xff]  ;;  %v462_v10 = vld [vmem:[%s1247_s6] sm:$0x3] }
  0x9d   :  { %829 = vmatpush1.bf16.msra.mxu1 %v828_v15  ;;  %v434_v15 = vld [vmem:[#allocation9 + $0x120] sm:$0xff] }
  0x9e   :  { %831 = vmatprep.subr.bf16.mxu1 %v830_v18  ;;  %v441_v18 = vld [vmem:[#allocation9 + $0x158] sm:$0xff]  ;;  %v872_v19 = vpack.c.bf16 %v436_v16, %v434_v15 }
  0x9f   :  { %869 = vmatpush1.bf16.msra.mxu0 %v868_v13  ;;  %v874_v20 = vpack.c.bf16 %v441_v18, %v439_v17  ;;  %v556_v13 = vld [vmem:[#allocation11 + $0x8] sm:$0xff]  ;;  %v574_v15 = vld [vmem:[#allocation11 + $0x98] sm:$0xff]  ;;  %v557_v18 = vld [vmem:[#allocation11 + $0x10] sm:$0xff] }
  0xa0   :  { %871 = vmatprep.subr.bf16.mxu0 %v870_v14  ;;  %v573_v14 = vld [vmem:[#allocation11 + $0x90] sm:$0xff]  ;;  %v900_v16 = vpack.c.bf16 %v556_v13, %v555_v11  ;;  %v467_v11 = vrot.slane %v462_v10, %v1207_v46 }
  0xa1   :  { %833 = vmatpush1.bf16.msra.mxu1 %v832_v21  ;;  %v438_v21 = vld [vmem:[#allocation9 + $0x140] sm:$0xff]  ;;  %v902_v17 = vpack.c.bf16 %v574_v15, %v573_v14 }
  0xa2   :  { %v876_v25 = vpack.c.bf16 %v440_v22, %v438_v21  ;;  %899 = vmatprep.subr.bf16.mxu1 %v898_v12  ;;  %v576_v21 = vld [vmem:[#allocation11 + $0xa8] sm:$0xff]  ;;  %v471_v12 = vrot.slane %v462_v10, %v1212_v48 }
  0xa3   :  { %873 = vmatpush1.bf16.msra.mxu0 %v872_v19  ;;  %v558_v19 = vld [vmem:[#allocation11 + $0x18] sm:$0xff] }
  0xa4   :  { %875 = vmatprep.subr.bf16.mxu0 %v874_v20  ;;  %v575_v20 = vld [vmem:[#allocation11 + $0xa0] sm:$0xff]  ;;  %v904_v22 = vpack.c.bf16 %v558_v19, %v557_v18 }
  0xa5   :  { %v906_v23 = vpack.c.bf16 %v576_v21, %v575_v20 }
  0xa7   :  { %877 = vmatpush1.bf16.msra.mxu0 %v876_v25  ;;  %v560_v25 = vld [vmem:[#allocation11 + $0x28] sm:$0xff] }
  0xa8   :  { %879 = vmatprep.subr.bf16.mxu0 %v878_v26  ;;  %v577_v26 = vld [vmem:[#allocation11 + $0xb0] sm:$0xff]  ;;  %v908_v28 = vpack.c.bf16 %v560_v25, %v559_v24 }
  0xa9   :  { %v910_v29 = vpack.c.bf16 %v578_v27, %v577_v26 }
  0xab   :  { %881 = vmatpush1.bf16.msra.mxu0 %v880_v31  ;;  %v562_v31 = vld [vmem:[#allocation11 + $0x38] sm:$0xff] }
  0xac   :  { %883 = vmatprep.subr.bf16.mxu0 %v882_v32  ;;  %v579_v32 = vld [vmem:[#allocation11 + $0xc0] sm:$0xff]  ;;  %v912_v34 = vpack.c.bf16 %v562_v31, %v561_v30 }
  0xad   :  { %v914_v35 = vpack.c.bf16 %v580_v33, %v579_v32  ;;  %v699_v30 = vld [vmem:[%s1250_s9] ss:$0 sm:$0xff] }
  0xaf   :  { %885 = vmatpush1.bf16.msra.mxu0 %v884_v37  ;;  %v564_v37 = vld [vmem:[#allocation11 + $0x48] sm:$0xff] }
  0xb0   :  { %887 = vmatprep.subr.bf16.mxu0 %v886_v38  ;;  %v581_v38 = vld [vmem:[#allocation11 + $0xd0] sm:$0xff]  ;;  %v916_v40 = vpack.c.bf16 %v564_v37, %v563_v36  ;;  %v685_v37 = vstv %s1251_s10 }
  0xb1   :  { %v918_v41 = vpack.c.bf16 %v582_v39, %v581_v38 }
  0xb3   :  { %889 = vmatpush1.bf16.msra.mxu0 %v888_v43  ;;  %v566_v43 = vld [vmem:[#allocation11 + $0x58] sm:$0xff] }
  0xb4   :  { %891 = vmatprep.subr.bf16.mxu0 %v890_v44  ;;  %v583_v44 = vld [vmem:[#allocation11 + $0xe0] sm:$0xff]  ;;  %v920_v0 = vpack.c.bf16 %v566_v43, %v565_v42 }
  0xb5   :  { %v922_v47 = vpack.c.bf16 %v584_v45, %v583_v44 }
  0xb7   :  { %893 = vmatpush1.bf16.msra.mxu0 %v892_v2  ;;  %v568_v2 = vld [vmem:[#allocation11 + $0x68] sm:$0xff] }
  0xb8   :  { %895 = vmatprep.subr.bf16.mxu0 %v894_v5  ;;  %v924_v3 = vpack.c.bf16 %v568_v2, %v567_v1  ;;  %v586_v5 = vld [vmem:[#allocation11 + $0xf8] sm:$0xff] }
  0xb9   :  { %v926_v6 = vpack.c.bf16 %v586_v5, %v585_v4 }
  0xbb   :  { %897 = vmatpush1.bf16.msra.mxu0 %v896_v8  ;;  %v570_v8 = vld [vmem:[#allocation11 + $0x78] sm:$0xff] }
  0xbc   :  { %v928_v9 = vpack.c.bf16 %v570_v8, %v569_v7 }
 0x14f   :  { %v226_v51 = vpop.f32.mrb[0].mxu0 }
 0x150   :  { %v227_v52 = vadd.f32 %v226_v51, %v153_v49  ;;  %v228_v53 = vpop.f32.mrb[1].mxu0 }
 0x151   :  { %v229_v54 = vadd.f32 %v228_v53, %v157_v50 }
 0x152   :  { %v237_v57 = vmax.f32 %v227_v52, 0.0 }
 0x153   :  { %v232_v55 = vpop.f32.mrb[2].mxu0  ;;  %v238_v56 = vmax.f32 %v229_v54, 0.0 }
 0x154   :  { %v233_v58 = vadd.f32 %v232_v55, %v153_v49  ;;  %v234_v59 = vpop.f32.mrb[3].mxu0  ;;  %v305_v49 = vld [vmem:[%s1245_s4] sm:$0x3] }
 0x155   :  { %v235_v60 = vadd.f32 %v234_v59, %v157_v50  ;;  %381 = vmatprep.mubr.f32.mxu1 %v238_v56  ;;  %v310_v50 = vrot.slane %v305_v49, %v1207_v46  ;;  %v314_v51 = vrot.slane %v305_v49, %v1212_v48  ;;  %v698_v48 = vld [vmem:[%s1249_s8] ss:$0 sm:$0xff] }
 0x156   :  { %382 = vmatmul.mubr.f32.vlgmr.msra.gmra.mrb[0].mxu1 %v237_v57  ;;  %v239_v62 = vmax.f32 %v233_v58, 0.0 }
 0x157   :  { %v240_v61 = vmax.f32 %v235_v60, 0.0  ;;  %901 = vmatpush3.bf16.msra.mxu1 %v900_v16 }
 0x158   :  { %903 = vmatprep.subr.bf16.mxu1 %v902_v17 }
 0x159   :  { %387 = vmatprep.mubr.f32.mxu1 %v240_v61 }
 0x15a   :  { %388 = vmatmul.mubr.f32.gmra.mrb[2].mxu1 %v239_v62 }
 0x15b   :  { %905 = vmatpush3.bf16.msra.mxu1 %v904_v22 }
 0x15c   :  { %907 = vmatprep.subr.bf16.mxu1 %v906_v23 }
 0x15f   :  { %909 = vmatpush3.bf16.msra.mxu1 %v908_v28 }
 0x160   :  { %911 = vmatprep.subr.bf16.mxu1 %v910_v29 }
 0x163   :  { %913 = vmatpush3.bf16.msra.mxu1 %v912_v34 }
 0x164   :  { %915 = vmatprep.subr.bf16.mxu1 %v914_v35 }
 0x167   :  { %917 = vmatpush3.bf16.msra.mxu1 %v916_v40 }
 0x168   :  { %919 = vmatprep.subr.bf16.mxu1 %v918_v41 }
 0x16b   :  { %921 = vmatpush3.bf16.msra.mxu1 %v920_v0 }
 0x16c   :  { %923 = vmatprep.subr.bf16.mxu1 %v922_v47 }
 0x16f   :  { %925 = vmatpush3.bf16.msra.mxu1 %v924_v3 }
 0x170   :  { %927 = vmatprep.subr.bf16.mxu1 %v926_v6 }
 0x173   :  { %929 = vmatpush3.bf16.msra.mxu1 %v928_v9 }
 0x229   :  { %v383_v52 = vpop.f32.mrb[0].mxu1 }
 0x22a   :  { %v384_v53 = vadd.f32 %v383_v52, %v310_v50  ;;  %v385_v54 = vpop.f32.mrb[1].mxu1 }
 0x22b   :  { %v386_v55 = vadd.f32 %v385_v54, %v314_v51 }
 0x22c   :  { %v394_v58 = vmax.f32 %v384_v53, 0.0 }
 0x22d   :  { %v395_v56 = vmax.f32 %v386_v55, 0.0  ;;  %v389_v57 = vpop.f32.mrb[2].mxu1 }
 0x22e   :  { %v390_v59 = vadd.f32 %v389_v57, %v310_v50  ;;  %v391_v60 = vpop.f32.mrb[3].mxu1 }
 0x22f   :  { %v392_v61 = vadd.f32 %v391_v60, %v314_v51  ;;  %538 = vmatprep.mubr.f32.mxu0 %v395_v56 }
 0x230   :  { %539 = vmatmul.mubr.f32.vlgmr.msra.gmra.mrb[4].mxu0 %v394_v58  ;;  %v396_v63 = vmax.f32 %v390_v59, 0.0 }
 0x231   :  { %v397_v62 = vmax.f32 %v392_v61, 0.0 }
 0x233   :  { %544 = vmatprep.mubr.f32.mxu0 %v397_v62 }
 0x234   :  { %545 = vmatmul.mubr.f32.gmra.mrb[6].mxu0 %v396_v63 }
 0x303   :  { %v540_v13 = vpop.f32.mrb[4].mxu0 }
 0x304   :  { %v541_v14 = vadd.f32 %v540_v13, %v467_v11  ;;  %v542_v15 = vpop.f32.mrb[5].mxu0 }
 0x305   :  { %v543_v16 = vadd.f32 %v542_v15, %v471_v12 }
 0x306   :  { %v551_v19 = vmax.f32 %v541_v14, 0.0 }
 0x307   :  { %v552_v17 = vmax.f32 %v543_v16, 0.0  ;;  %v546_v18 = vpop.f32.mrb[6].mxu0 }
 0x308   :  { %v547_v20 = vadd.f32 %v546_v18, %v467_v11  ;;  %v548_v21 = vpop.f32.mrb[7].mxu0 }
 0x309   :  { %v549_v22 = vadd.f32 %v548_v21, %v471_v12  ;;  %658 = vmatprep.mubr.f32.mxu1 %v552_v17 }
 0x30a   :  { %659 = vmatmul.mubr.f32.vlgmr.msra.gmra.mrb[4].mxu1 %v551_v19  ;;  %v553_v24 = vmax.f32 %v547_v20, 0.0 }
 0x30b   :  { %v554_v23 = vmax.f32 %v549_v22, 0.0 }
 0x30d   :  { %663 = vmatprep.mubr.f32.mxu1 %v554_v23 }
 0x30e   :  { %664 = vmatmul.mubr.f32.gmra.mrb[6].mxu1 %v553_v24 }
 0x3dd   :  { %v732_v25 = vpop.f32.mrb[4].mxu1 }
 0x3de   :  { %v733_v46 = vpop.f32.mrb[5].mxu1 }
 0x3df   :  { %v734_v26 = vadd.f32 %v733_v46, %v732_v25 }
 0x3e1   :  { %v735_v27 = vpop.f32.mrb[6].mxu1  ;;  %v661_v28 = vadd.f32 %v734_v26, %v698_v48 }
 0x3e2   :  { %v736_v29 = vpop.f32.mrb[7].mxu1 }
 0x3e3   :  { %v737_v31 = vadd.f32 %v736_v29, %v735_v27  ;;  %v669_v32 = vmax.f32 %v661_v28, 0.0 }
 0x3e5   :  { %v666_v33 = vadd.f32 %v737_v31, %v698_v48  ;;  %v679_v34 = vmul.f32 %v699_v30, %v669_v32 }
 0x3e7   :  { %v670_v35 = vmax.f32 %v666_v33, 0.0  ;;  %681 = vadd.xlane.f32.xlu0 %v679_v34 }
 0x3e9   :  { %v680_v36 = vmul.f32 %v699_v30, %v670_v35 }
 0x3eb   :  { %683 = vadd.xlane.f32.xlu0 %v680_v36 }
 0x474   :  { %v682_v38 = vpop.xlane.xlu0 %681 }
 0x475   :  { %v686_v39 = vadd.f32 %v685_v37, %v682_v38 }
 0x477   :  { %689 = vst.msk [vmem:[%s1252_s11] sm:$0xff] %vm688_vm1, %v686_v39 }
 0x478   :  { %v684_v40 = vpop.xlane.xlu0 %683 }
 0x479   :  { %v687_v41 = vadd.f32 %v685_v37, %v684_v40 }
 0x47b   :  { %690 = vst.msk [vmem:[%s1252_s11 + $0x8] sm:$0xff] %vm688_vm1, %v687_v41 }
 0x47c   :  { %695 = vsyncpa [#allocation5], 1 }
 0x47d   :  { %696 = vsyncpa [#allocation7], 1 }
 0x47e   :  { %697 = vsyncpa [#allocation10], 1 }

</bundles_post_ra>
